<compile_context>
chip_gen: v5e
topology: v5e:2x2
jax: 0.10.0
libtpu: 0.0.40
codegen_flags: <defaults>
</compile_context>

<pallas_src>
import numpy as np
import jax
import jax.numpy as jnp
from jax.experimental import pallas as pl
from jax.experimental.pallas import tpu as pltpu


def _round_up(x, m):
    return ((x + m - 1) // m) * m


def _cdiv(a, b):
    return -(-a // b)


def _patch_embed_kernel(x_ref, w_ref, b_ref, o_ref):
    # x_ref: (tm, K_pad) patch tile, w_ref: (K_pad, tn) weight, b_ref: (1, tn) f32.
    acc = jnp.dot(x_ref[...], w_ref[...], preferred_element_type=jnp.float32)
    o_ref[...] = (acc + b_ref[...]).astype(o_ref.dtype)


def prepare_patch_embed_params(weight, bias, *, compute_dtype=jnp.bfloat16):
    """One-time parameter prep (hoisted out of the per-forward path).

    weight: (E, C, p, p) PyTorch Conv2d layout, bias: (E,).
    Returns:
      w_mat: (K_pad, E_pad) in `compute_dtype`; rows in (c, kh, kw) order
             (the natural Conv2d flatten order), K zero-padded to a multiple
             of 128 and E zero-padded to a multiple of 128 (lane-dense).
      b_mat: (1, E_pad) float32, zero-padded.
    """
    E, C, p, _ = weight.shape
    K = C * p * p
    K_pad = _round_up(K, 128)
    E_pad = _round_up(E, 128)
    # (E, C, p, p) -> (C, kh, kw, E): feature order (c, kh, kw) matches the
    # im2col below (kw innermost -> stride-1 runs of length p in the gather).
    w_mat = jnp.transpose(weight, (1, 2, 3, 0)).reshape(K, E)
    b_mat = bias.reshape(1, E).astype(jnp.float32)
    if K_pad != K or E_pad != E:
        w_mat = jnp.pad(w_mat, ((0, K_pad - K), (0, E_pad - E)))
        b_mat = jnp.pad(b_mat, ((0, 0), (0, E_pad - E)))
    return w_mat.astype(compute_dtype), b_mat


def patch_embedding_forward(x, w_mat, b_mat, embedding_dim, patch_size, *,
                            tm=512, out_dtype=None):
    """x: (B, C, H, W) NCHW. w_mat/b_mat from prepare_patch_embed_params.

    Returns (B, N, E) with N = (H/p)*(W/p), matching
    Conv2d(k=p, stride=p) -> Flatten(2,3) -> permute(0,2,1).
    """
    B, C, H, W = x.shape
    p = patch_size
    assert H % p == 0 and W % p == 0, "image size must be divisible by patch size"
    nh, nw = H // p, W // p
    N = nh * nw
    M = B * N
    K = C * p * p
    E = embedding_dim
    K_pad, E_pad = w_mat.shape
    compute_dtype = w_mat.dtype
    if out_dtype is None:
        out_dtype = compute_dtype          # bf16 compute -> bf16 writeback
    c_size = np.dtype(compute_dtype).itemsize
    o_size = np.dtype(out_dtype).itemsize

    # --- glue: im2col / patchify, feature order (c, kh, kw) ----------------
    # kw is innermost -> the gather from NCHW moves contiguous p-element runs.
    patches = x.reshape(B, C, nh, p, nw, p)
    patches = patches.transpose(0, 2, 4, 1, 3, 5)          # (B, nh, nw, C, ph, pw)
    patches = patches.reshape(M, K).astype(compute_dtype)
    if K_pad != K:
        # TODO(synk): fold this pad into the fused in-kernel gather once the
        # im2col itself is moved inside the kernel.
        patches = jnp.pad(patches, ((0, 0), (0, K_pad - K)))

    # --- tile selection -----------------------------------------------------
    VMEM_BUDGET = 40 << 20          # double-buffered working-set cap (v7x: 64 MiB physical)
    W_RESIDENT_BUDGET = 16 << 20    # weight (x2 buffers) must fit this to stay resident

    def working_set(tm_, tn_):
        return (2 * tm_ * K_pad * c_size        # x tile (double-buffered)
                + 2 * tm_ * tn_ * o_size        # out tile
                + 2 * K_pad * tn_ * c_size      # weight
                + 2 * tn_ * 4)                  # bias (f32)

    weight_resident = (2 * K_pad * E_pad * c_size + 2 * E_pad * 4) <= W_RESIDENT_BUDGET
    if weight_resident:
        tn = E_pad
    else:
        tn = max(t for t in (512, 256, 128) if E_pad % t == 0)

    tm_eff = tm if M > tm else M                # whole-M block when M is small
    while tm_eff > 256 and working_set(tm_eff, tn) > VMEM_BUDGET:
        tm_eff //= 2
    grid_m = _cdiv(M, tm_eff)

    # v7x megacore: prefer an even grid_m so both TensorCores get equal work.
    if grid_m > 1 and grid_m % 2 == 1 and tm_eff > 128:
        tm_try = _round_up(_cdiv(M, grid_m + 1), 128)
        if tm_try >= 128:
            gm_try = _cdiv(M, tm_try)
            if gm_try % 2 == 0 and working_set(tm_try, tn) <= VMEM_BUDGET:
                tm_eff, grid_m = tm_try, gm_try

    vmem_limit = int(min(48 << 20, max(32 << 20, working_set(tm_eff, tn) + (4 << 20))))

    # --- pallas_call ----------------------------------------------------------
    if weight_resident:
        # 1-D grid over M: weight/bias block index never changes -> DMA'd once.
        grid = (grid_m,)
        in_specs = [
            pl.BlockSpec((tm_eff, K_pad), lambda i: (i, 0)),    # patch tile (streams)
            pl.BlockSpec((K_pad, E_pad), lambda i: (0, 0)),     # weight (VMEM-resident)
            pl.BlockSpec((1, E_pad), lambda i: (0, 0)),         # bias  (VMEM-resident)
        ]
        out_specs = pl.BlockSpec((tm_eff, E_pad), lambda i: (i, 0))
        dims = ("parallel",)
    else:
        # Huge-E fallback: N axis OUTER so each weight stripe is fetched once
        # total (not once per M tile); activations re-stream grid_n times.
        grid_n = E_pad // tn
        grid = (grid_n, grid_m)
        in_specs = [
            pl.BlockSpec((tm_eff, K_pad), lambda n, m: (m, 0)),
            pl.BlockSpec((K_pad, tn), lambda n, m: (0, n)),
            pl.BlockSpec((1, tn), lambda n, m: (0, n)),
        ]
        out_specs = pl.BlockSpec((tm_eff, tn), lambda n, m: (m, n))
        dims = ("parallel", "parallel")

    # out_shape is (M, E) (not E_pad): Pallas masks only the edge columns when
    # E % 128 != 0, avoiding a full post-kernel slice round trip.
    out = pl.pallas_call(
        _patch_embed_kernel,
        out_shape=jax.ShapeDtypeStruct((M, E), out_dtype),
        grid_spec=pltpu.PrefetchScalarGridSpec(
            num_scalar_prefetch=0,
            grid=grid,
            in_specs=in_specs,
            out_specs=out_specs,
        ),
        compiler_params=pltpu.CompilerParams(
            dimension_semantics=dims,
            vmem_limit_bytes=vmem_limit,
        ),
    )(patches, w_mat, b_mat)

    return out.reshape(B, N, E)


def patch_embedding(x, weight, bias, patch_size, *, tm=512,
                    compute_dtype=jnp.bfloat16, out_dtype=None):
    """Drop-in wrapper: weight (E, C, p, p), bias (E,). For repeated forward
    passes call prepare_patch_embed_params once and use
    patch_embedding_forward directly (avoids per-call weight prep)."""
    w_mat, b_mat = prepare_patch_embed_params(weight, bias,
                                              compute_dtype=compute_dtype)
    return patch_embedding_forward(x, w_mat, b_mat, weight.shape[0], patch_size,
                                   tm=tm, out_dtype=out_dtype)


if __name__ == "__main__":
    # Small shapes: batch=2, channels=3 (module default), image 16x16, patch=8,
    # embedding=32.  K = 3*8*8 = 192 (exercises K padding to 256) and
    # E_pad = 128 > E = 32 (exercises the masked-edge-column output store).
    B, C, H, W = 2, 3, 16, 16
    patch_size = 8
    embedding_dim = 32

    key = jax.random.PRNGKey(0)
    kx, kw, kb = jax.random.split(key, 3)
    x = jax.random.normal(kx, (B, C, H, W), dtype=jnp.float32)
    weight = jax.random.normal(
        kw, (embedding_dim, C, patch_size, patch_size), dtype=jnp.float32) * 0.02
    bias = jax.random.normal(kb, (embedding_dim,), dtype=jnp.float32) * 0.02

    N = (H // patch_size) * (W // patch_size)

    def conv_ref(x_in, w_in):
        out = jax.lax.conv_general_dilated(
            x_in, w_in,
            window_strides=(patch_size, patch_size),
            padding="VALID",
            dimension_numbers=("NCHW", "OIHW", "NCHW"),
            preferred_element_type=jnp.float32,
        ) + bias[None, :, None, None]
        return out.reshape(B, embedding_dim, -1).transpose(0, 2, 1)

    # Default bf16-compute path (bf16 output; reference uses the same
    # bf16-rounded inputs with f32 accumulation).
    out_bf16 = jax.block_until_ready(patch_embedding(x, weight, bias, patch_size))
    assert out_bf16.shape == (B, N, embedding_dim)
    assert out_bf16.dtype == jnp.bfloat16
    ref_bf16 = conv_ref(x.astype(jnp.bfloat16), weight.astype(jnp.bfloat16))
    assert jnp.allclose(out_bf16.astype(jnp.float32), ref_bf16,
                        atol=1e-2, rtol=1e-2), "bf16 path mismatch vs reference"

    # f32-compute path matches the exact f32 Conv2d semantics.
    out_f32 = jax.block_until_ready(
        patch_embedding(x, weight, bias, patch_size, compute_dtype=jnp.float32))
    assert out_f32.dtype == jnp.float32
    ref_f32 = conv_ref(x, weight)
    assert jnp.allclose(out_f32, ref_f32, atol=1e-3, rtol=1e-3), \
        "f32 path mismatch vs reference"

    print("KERNEL_OK")
</pallas_src>

<mosaic_0001>
module attributes {stable_mosaic.version = 11 : i64} {
  func.func @_patch_embed_kernel(%arg0: i32, %arg1: memref<8x256xbf16, #tpu.memory_space<vmem>>, %arg2: memref<256x128xbf16, #tpu.memory_space<vmem>>, %arg3: memref<1x128xf32, #tpu.memory_space<vmem>>, %arg4: memref<8x128xbf16, #tpu.memory_space<vmem>>) attributes {dimension_semantics = [#tpu.dimension_semantics<parallel>], iteration_bounds = array<i64: 1>, scalar_prefetch = 0 : i64, scratch_operands = 0 : i64, tpu.core_type = #tpu.core_type<tc>, window_params = [{transform_indices = @transform_0, window_bounds = array<i64: 8, 256>}, {pipeline_mode = #tpu.pipeline_mode<synchronous>, transform_indices = @transform_1, window_bounds = array<i64: 256, 128>}, {pipeline_mode = #tpu.pipeline_mode<synchronous>, transform_indices = @transform_2, window_bounds = array<i64: 1, 128>}, {transform_indices = @transform_3, window_bounds = array<i64: 8, 128>}]} {
    %c0 = arith.constant 0 : index
    %c0_0 = arith.constant 0 : index
    %0 = vector.load %arg1[%c0, %c0_0] : memref<8x256xbf16, #tpu.memory_space<vmem>>, vector<8x256xbf16>
    %c0_1 = arith.constant 0 : index
    %c0_2 = arith.constant 0 : index
    %1 = vector.load %arg2[%c0_1, %c0_2] : memref<256x128xbf16, #tpu.memory_space<vmem>>, vector<256x128xbf16>
    %cst = arith.constant dense<0.000000e+00> : vector<8x128xf32>
    %2 = tpu.matmul %0, %1, %cst {dimension_numbers = #tpu.dot_dimension_numbers<[1], [0], [0], [1], [0, 0, 1, 1], [], []>} : vector<8x256xbf16>, vector<256x128xbf16>, vector<8x128xf32> -> vector<8x128xf32>
    %c0_3 = arith.constant 0 : index
    %c0_4 = arith.constant 0 : index
    %3 = vector.load %arg3[%c0_3, %c0_4] : memref<1x128xf32, #tpu.memory_space<vmem>>, vector<1x128xf32>
    %4 = vector.broadcast %3 : vector<1x128xf32> to vector<8x128xf32>
    %5 = arith.addf %2, %4 : vector<8x128xf32>
    %6 = arith.truncf %5 : vector<8x128xf32> to vector<8x128xbf16>
    %c0_5 = arith.constant 0 : index
    %c0_6 = arith.constant 0 : index
    %7 = vector.load %arg4[%c0_5, %c0_6] : memref<8x128xbf16, #tpu.memory_space<vmem>>, vector<8x128xbf16>
    tpu.vector_store %arg4[%c0_5, %c0_6], %6 {strides = array<i32>} : memref<8x128xbf16, #tpu.memory_space<vmem>>, vector<8x128xbf16>,
    return
  }
  func.func @transform_0(%arg0: i32) -> (i32, i32) {
    %c0_i32 = arith.constant 0 : i32
    %c0_i32_0 = arith.constant 0 : i32
    return %arg0, %c0_i32 : i32, i32
  }
  func.func @transform_1(%arg0: i32) -> (i32, i32) {
    %c0_i32 = arith.constant 0 : i32
    %c0_i32_0 = arith.constant 0 : i32
    %c0_i32_1 = arith.constant 0 : i32
    return %c0_i32, %c0_i32_0 : i32, i32
  }
  func.func @transform_2(%arg0: i32) -> (i32, i32) {
    %c0_i32 = arith.constant 0 : i32
    %c0_i32_0 = arith.constant 0 : i32
    %c0_i32_1 = arith.constant 0 : i32
    return %c0_i32, %c0_i32_0 : i32, i32
  }
  func.func @transform_3(%arg0: i32) -> (i32, i32) {
    %c0_i32 = arith.constant 0 : i32
    %c0_i32_0 = arith.constant 0 : i32
    return %arg0, %c0_i32 : i32, i32
  }
}

</mosaic_0001>

<bundles_post_ra>
// kernel: tpu_custom_call.1
= control target key start
LH: loop header
LB: loop body
LE: loop exit
PB: predicated region body
PF: predicated region fallthrough
CT: control target
= control target key end

     0   :  { %8 = vsyncpa [#allocation3], 0  ;;  %s432_s0 = inlined_call_operand.hbm [shape: bf16[8,256], index: 0, kind: input, shape index: {}]   ;;  %s433_s1 = inlined_call_operand.hbm [shape: bf16[256,128], index: 1, kind: input, shape index: {}]   ;;  %s434_s2 = inlined_call_operand.vmem [shape: f32[1,128], index: 2, kind: input, shape index: {}]   ;;  %s435_s3 = inlined_call_operand.hbm [shape: bf16[8,32], index: 3, kind: output, shape index: {}]  }
   0x1   :  { %9 = vsyncpa [#allocation6], 0 }
   0x2   :  { %10 = vsyncpa [#allocation4], 0  ;;  %s16_s14 = sshll.u32 %s432_s0, 4  ;;  %s395_s15 = smov [#allocation2]   ;;  %s17_s14 = int_to_ptr.hbm [resolvable:$true] %s16_s14 }
   0x3   :  { %s18_s16 = sshll.u32 %s395_s15, 4  ;;  %s26_s19 = sshll.u32 %s433_s1, 4  ;;  %s19_s16 = int_to_ptr.vmem [resolvable:$true] %s18_s16  ;;  %s27_s19 = int_to_ptr.hbm [resolvable:$true] %s26_s19 }
   0x4   :  { %21 = dma.hbm_to_vmem [thread:$0]  %s17_s14, 128, %s19_s16, [#allocation3]  }
   0x5   :  { %s396_s20 = smov [#allocation5]   ;;  %s397_s22 = smov 64  }
   0x6   :  { %s28_s21 = sshll.u32 %s396_s20, 4  ;;  %s398_s23 = smov 4   ;;  %s29_s21 = int_to_ptr.vmem [resolvable:$true] %s28_s21 }
   0x7   :  { %34 = dma.hbm_to_vmem [thread:$0]  %s27_s19, 2048, %s29_s21, [#allocation6], %s397_s22, %s397_s22, %s398_s23  }
   0x8   :  { %389 = dma.done.wait [#allocation3], 128  }
   0x9   :  { %390 = vsyncadd [#allocation3], 4294967168 }
   0xa   :  { %391 = dma.done.wait [#allocation6], 2048  }
   0xb   :  { %392 = vsyncadd [#allocation6], 4294965248  ;;  %v302_v0 = vld [vmem:[#allocation5 + $0x38] sm:$0xff]  ;;  %v301_v2 = vld [vmem:[#allocation5 + $0x30] sm:$0xff]  ;;  %s399_s24 = smov [#allocation7]   ;;  %s220_s28 = sshll.u32 %s435_s3, 4  ;;  %s221_s28 = int_to_ptr.hbm [resolvable:$true] %s220_s28 }
   0xc   :  { %v310_v1 = vld [vmem:[#allocation5 + $0x78] sm:$0xff]  ;;  %185 = vmatpush.bf16.msra.mxu0 %v302_v0  ;;  %v309_v3 = vld [vmem:[#allocation5 + $0x70] sm:$0xff]  ;;  %v300_v4 = vld [vmem:[#allocation5 + $0x28] sm:$0xff]  ;;  %s218_s25 = sshll.u32 %s399_s24, 4  ;;  %s219_s25 = int_to_ptr.vmem [resolvable:$true] %s218_s25 }
   0xd   :  { %198 = vmatpush.bf16.msra.mxu1 %v310_v1  ;;  %v308_v5 = vld [vmem:[#allocation5 + $0x68] sm:$0xff]  ;;  %v299_v6 = vld [vmem:[#allocation5 + $0x20] sm:$0xff]  ;;  %v298_v8 = vld [vmem:[#allocation5 + $0x18] sm:$0xff] }
   0xe   :  { %v307_v7 = vld [vmem:[#allocation5 + $0x60] sm:$0xff]  ;;  %v306_v9 = vld [vmem:[#allocation5 + $0x58] sm:$0xff]  ;;  %v297_v10 = vld [vmem:[#allocation5 + $0x10] sm:$0xff] }
   0xf   :  { %v305_v11 = vld [vmem:[#allocation5 + $0x50] sm:$0xff]  ;;  %v296_v12 = vld [vmem:[#allocation5 + $0x8] sm:$0xff]  ;;  %v45_v14 = vld [vmem:[#allocation2] sm:$0xff] }
  0x10   :  { %186 = vmatpush.bf16.msra.mxu0 %v301_v2  ;;  %v304_v13 = vld [vmem:[#allocation5 + $0x48] sm:$0xff]  ;;  %v83_v15 = vunpack.c.l.b16 %v45_v14  ;;  %v84_v16 = vunpack.c.h.b16 %v45_v14  ;;  %v295_v17 = vld [vmem:[#allocation5] sm:$0xff]  ;;  %v316_v21 = vld [vmem:[%s434_s2] ss:$0 sm:$0xff] }
  0x11   :  { %199 = vmatpush.bf16.msra.mxu1 %v309_v3  ;;  %v303_v18 = vld [vmem:[#allocation5 + $0x40] sm:$0xff] }
  0x12   :  { %v85_v19 = vpack.c.b16 %v83_v15, %v83_v15  ;;  %v86_v20 = vpack.c.b16 %v84_v16, %v84_v16 }
  0x14   :  { %187 = vmatpush.bf16.msra.mxu0 %v300_v4 }
  0x15   :  { %200 = vmatpush.bf16.msra.mxu1 %v308_v5 }
  0x18   :  { %188 = vmatpush.bf16.msra.mxu0 %v299_v6 }
  0x19   :  { %201 = vmatpush.bf16.msra.mxu1 %v307_v7 }
  0x1c   :  { %189 = vmatpush.bf16.msra.mxu0 %v298_v8 }
  0x1d   :  { %202 = vmatpush.bf16.msra.mxu1 %v306_v9 }
  0x20   :  { %190 = vmatpush.bf16.msra.mxu0 %v297_v10 }
  0x21   :  { %203 = vmatpush.bf16.msra.mxu1 %v305_v11 }
  0x24   :  { %191 = vmatpush.bf16.msra.mxu0 %v296_v12 }
  0x25   :  { %204 = vmatpush.bf16.msra.mxu1 %v304_v13 }
  0x28   :  { %192 = vmatpush.bf16.msra.mxu0 %v295_v17 }
  0x29   :  { %205 = vmatpush.bf16.msra.mxu1 %v303_v18 }
  0x2b   :  { %193 = vmatmul.bf16.vlgmr.msra.gmra.mxu0 %v85_v19 }
  0x2c   :  { %206 = vmatmul.bf16.vlgmr.msra.gmra.mxu1 %v86_v20 }
  0xa8   :  { %v194_v22 = vpop.f32.mrf.mxu0 }
  0xa9   :  { %v207_v23 = vpop.f32.mrf.mxu1  ;;  %v195_v24 = vadd.f32 %v316_v21, %v194_v22 }
  0xab   :  { %v208_v25 = vadd.f32 %v207_v23, %v195_v24 }
  0xad   :  { %v211_v26 = vpack.c.bf16 %v208_v25, %v208_v25 }
  0xaf   :  { %212 = vst [vmem:[#allocation7] sm:$0xf] %v211_v26 }
  0xb0   :  { %v196_v27 = vpop.f32.mrf.mxu0  ;;  %223 = dma.vmem_to_hbm [thread:$0]  %s219_s25, 64, %s221_s28, [#allocation4]  }
  0xb1   :  { %v209_v28 = vpop.f32.mrf.mxu1 }
  0xb2   :  { %393 = dma.done.wait [#allocation4], 64  }
  0xb3   :  { %394 = vsyncadd [#allocation4], 4294967232 }
  0xb4   :  { %228 = vsyncpa [#allocation3], 1 }
  0xb5   :  { %229 = vsyncpa [#allocation6], 1 }
  0xb6   :  { %230 = vsyncpa [#allocation4], 1 }

</bundles_post_ra>
